<compile_context>
chip_gen: v6e
topology: v6e:2x2x1
jax: 0.10.0
libtpu: 0.0.40
codegen_flags: <defaults>
</compile_context>

<pallas_src>
import functools

import jax
import jax.numpy as jnp
from jax import lax
from jax.experimental import pallas as pl
from jax.experimental.pallas import tpu as pltpu


def _round_up(v, m):
    return (v + m - 1) // m * m


def _cdiv(a, b):
    return -(-a // b)


# ---------------------------------------------------------------------------
# Primary (floating-point) path: lane-dense one-hot selection matmul.
# ---------------------------------------------------------------------------
def _select_kernel(x_ref, s_ref, o_ref, *, needs_mask, nchunks, valid_last):
    xv = x_ref[...]
    if needs_mask:
        # Only the last row-chunk's input block can run past H*W; zero the pad
        # so unspecified (possibly non-finite) values cannot leak through the
        # zero-weight selector columns (0 * NaN = NaN).
        last = pl.program_id(1) == nchunks - 1
        col = lax.broadcasted_iota(jnp.int32, xv.shape, 1)
        keep = jnp.logical_or(jnp.logical_not(last), col < valid_last)
        xv = jnp.where(keep, xv, jnp.zeros_like(xv))
    # One-hot selection: exact for finite floats; f32 accumulation on the MXU.
    o_ref[...] = jnp.dot(
        xv, s_ref[...], preferred_element_type=jnp.float32).astype(o_ref.dtype)


def _choose_row_chunk(h, w, ho, wo, itemsize):
    """Output rows per chunk (tho).

    A single full-spatial chunk is preferred (fully lane-dense output, one
    small resident selector) whenever the selector stays small and the matmul
    stays comfortably below v5e's HBM/MXU balance point.  Otherwise chunk, but
    only with widths that keep both non-full flat block dims 128-lane aligned
    (required by the (8,128) block rule)."""
    sel_small = h * w * ho * wo * itemsize <= (512 << 10)
    mxu_hidden = (2.0 * ho * wo) / itemsize <= 192.0
    if (sel_small and mxu_hidden) or ho <= 1:
        return ho
    cands = [t for t in range(1, ho)
             if (2 * t * w) % 128 == 0 and (t * wo) % 128 == 0]
    if not cands:
        return ho                      # fall back to one full-spatial chunk
    dense = [t for t in cands if t * wo >= 128]
    return min(dense) if dense else max(cands)


def _choose_plane_tile(p, row_bytes, max_block_bytes, min_steps=4):
    """Plane tile (sublane dim): multiple of 8 (or the full p), sized to the
    VMEM budget, and capped so the plane grid axis has >= min_steps steps
    whenever p allows (keeps v7x's two TensorCores busy and the pipeline
    overlapped)."""
    if p <= 8:
        return p
    pt = min(max(1, max_block_bytes // row_bytes), _cdiv(p, min_steps), p)
    return max(8, pt // 8 * 8)


def _pool_select(xf, h, w, ho, wo, max_block_bytes):
    p = xf.shape[0]
    dt = xf.dtype
    itemsize = dt.itemsize

    tho = _choose_row_chunk(h, w, ho, wo, itemsize)
    nchunks = _cdiv(ho, tho)
    if nchunks == 1:
        in_cols, rows_out = h * w, ho
    else:
        in_cols, rows_out = 2 * tho * w, tho
    out_cols = rows_out * wo
    needs_mask = nchunks * in_cols > h * w
    valid_last = h * w - (nchunks - 1) * in_cols

    # One-hot selector in the input dtype: sel[(2i)*w + 2j, i*wo + j] = 1.
    ii = jnp.arange(rows_out)
    jj = jnp.arange(wo)
    src = (2 * ii[:, None] * w + 2 * jj[None, :]).reshape(-1)
    sel = jnp.zeros((in_cols, out_cols), dt).at[src, jnp.arange(out_cols)].set(1)

    row_bytes = (_round_up(in_cols, 128) + _round_up(out_cols, 128)) * itemsize
    pt = _choose_plane_tile(p, row_bytes, max_block_bytes)
    grid = (_cdiv(p, pt), nchunks)

    kernel = functools.partial(_select_kernel, needs_mask=needs_mask,
                               nchunks=nchunks, valid_last=valid_last)
    bytes_accessed = (p * h * w + p * ho * wo + in_cols * out_cols) * itemsize

    out = pl.pallas_call(
        kernel,
        out_shape=jax.ShapeDtypeStruct((p, ho * wo), dt),
        grid=grid,
        in_specs=[pl.BlockSpec((pt, in_cols), lambda i, r: (i, r)),
                  pl.BlockSpec((in_cols, out_cols), lambda i, r: (0, 0))],
        out_specs=pl.BlockSpec((pt, out_cols), lambda i, r: (i, r)),
        compiler_params=pltpu.CompilerParams(
            dimension_semantics=("parallel", "arbitrary")),
        cost_estimate=pl.CostEstimate(
            flops=2 * p * in_cols * out_cols * nchunks,
            transcendentals=0,
            bytes_accessed=bytes_accessed),
    )(xf, sel)
    return out.reshape(p, ho, wo)


# ---------------------------------------------------------------------------
# Non-float path (MXU selection is float-only; v7x's MXU has no integer path):
# dtype-preserving strided-copy kernel over (Pt, H, W) plane tiles.
# TODO(synk): lane-stride-2 ref loads may not lower on every Mosaic build;
# this path is only reached for integer/bool inputs, which the FPN never emits.
# ---------------------------------------------------------------------------
def _strided_kernel(x_ref, o_ref):
    _, ho, wo = o_ref.shape
    o_ref[...] = x_ref[:, pl.ds(0, ho, stride=2), pl.ds(0, wo, stride=2)]


def _pool_strided(x3, ho, wo, max_block_bytes):
    p, h, w = x3.shape
    itemsize = x3.dtype.itemsize
    per_plane = (_round_up(h, 8) * _round_up(w, 128)
                 + _round_up(ho, 8) * _round_up(wo, 128)) * itemsize
    pt = min(p, max(1, max_block_bytes // per_plane))
    return pl.pallas_call(
        _strided_kernel,
        out_shape=jax.ShapeDtypeStruct((p, ho, wo), x3.dtype),
        grid=(_cdiv(p, pt),),
        in_specs=[pl.BlockSpec((pt, h, w), lambda i: (i, 0, 0))],
        out_specs=pl.BlockSpec((pt, ho, wo), lambda i: (i, 0, 0)),
        compiler_params=pltpu.CompilerParams(dimension_semantics=("parallel",)),
        cost_estimate=pl.CostEstimate(
            flops=0, transcendentals=0,
            bytes_accessed=(p * h * w + p * ho * wo) * itemsize),
    )(x3)


# ---------------------------------------------------------------------------
# Module wrapper (forward of LastLevelMaxPool): returns [p6], NCHW like PyTorch.
# ---------------------------------------------------------------------------
def last_level_max_pool(x, *, max_block_bytes=4 * 1024 * 1024):
    n, c, h, w = x.shape
    ho = (h - 1) // 2 + 1
    wo = (w - 1) // 2 + 1
    p = n * c
    if jnp.issubdtype(x.dtype, jnp.floating):
        out = _pool_select(x.reshape(p, h * w), h, w, ho, wo, max_block_bytes)
    else:
        out = _pool_strided(x.reshape(p, h, w), ho, wo, max_block_bytes)
    return [out.reshape(n, c, ho, wo)]


if __name__ == "__main__":
    key = jax.random.PRNGKey(0)
    # Small P5-like feature map: batch=2, channels=4, spatial=16x16.
    x = jax.random.normal(key, (2, 4, 16, 16), dtype=jnp.float32)

    (p6,) = jax.jit(last_level_max_pool)(x)
    p6 = jax.block_until_ready(p6)

    # Reference: stride-2 subsample (exactly what max_pool2d(k=1, s=2) does).
    ref = x[:, :, ::2, ::2]
    assert p6.shape == ref.shape and p6.dtype == ref.dtype
    assert bool(jnp.allclose(p6, ref, atol=0.0, rtol=0.0))

    print("KERNEL_OK")
</pallas_src>

<mosaic_0001>
module attributes {stable_mosaic.version = 11 : i64} {
  func.func @_select_kernel(%arg0: i32, %arg1: i32, %arg2: memref<8x256xf32, #tpu.memory_space<vmem>>, %arg3: memref<256x64xf32, #tpu.memory_space<vmem>>, %arg4: memref<8x64xf32, #tpu.memory_space<vmem>>) attributes {dimension_semantics = [#tpu.dimension_semantics<parallel>, #tpu.dimension_semantics<arbitrary>], iteration_bounds = array<i64: 1, 1>, scalar_prefetch = 0 : i64, scratch_operands = 0 : i64, tpu.core_type = #tpu.core_type<tc>, window_params = [{transform_indices = @transform_0, window_bounds = array<i64: 8, 256>}, {pipeline_mode = #tpu.pipeline_mode<synchronous>, transform_indices = @transform_1, window_bounds = array<i64: 256, 64>}, {transform_indices = @transform_2, window_bounds = array<i64: 8, 64>}]} {
    %c0 = arith.constant 0 : index
    %c0_0 = arith.constant 0 : index
    %0 = vector.load %arg2[%c0, %c0_0] : memref<8x256xf32, #tpu.memory_space<vmem>>, vector<8x256xf32>
    %c0_1 = arith.constant 0 : index
    %c0_2 = arith.constant 0 : index
    %1 = vector.load %arg3[%c0_1, %c0_2] : memref<256x64xf32, #tpu.memory_space<vmem>>, vector<256x64xf32>
    %cst = arith.constant dense<0.000000e+00> : vector<8x64xf32>
    %2 = tpu.matmul %0, %1, %cst {dimension_numbers = #tpu.dot_dimension_numbers<[1], [0], [0], [1], [0, 0, 1, 1], [], []>} : vector<8x256xf32>, vector<256x64xf32>, vector<8x64xf32> -> vector<8x64xf32>
    %c0_3 = arith.constant 0 : index
    %c0_4 = arith.constant 0 : index
    %3 = vector.load %arg4[%c0_3, %c0_4] : memref<8x64xf32, #tpu.memory_space<vmem>>, vector<8x64xf32>
    tpu.vector_store %arg4[%c0_3, %c0_4], %2 {strides = array<i32>} : memref<8x64xf32, #tpu.memory_space<vmem>>, vector<8x64xf32>,
    return
  }
  func.func @transform_0(%arg0: i32, %arg1: i32) -> (i32, i32) {
    %c0_i32 = arith.constant 0 : i32
    return %arg0, %arg1 : i32, i32
  }
  func.func @transform_1(%arg0: i32, %arg1: i32) -> (i32, i32) {
    %c0_i32 = arith.constant 0 : i32
    %c0_i32_0 = arith.constant 0 : i32
    %c0_i32_1 = arith.constant 0 : i32
    return %c0_i32, %c0_i32_0 : i32, i32
  }
  func.func @transform_2(%arg0: i32, %arg1: i32) -> (i32, i32) {
    %c0_i32 = arith.constant 0 : i32
    return %arg0, %arg1 : i32, i32
  }
}

</mosaic_0001>

<bundles_post_ra>
// kernel: last_level_max_pool.1
= control target key start
LH: loop header
LB: loop body
LE: loop exit
PB: predicated region body
PF: predicated region fallthrough
CT: control target
= control target key end

     0   :  { %vm115_vm0 = vcmask 523264   ;;  %s276_s1 = inlined_call_operand.vmem [shape: f32[256,64], index: 1, kind: input, shape index: {}]   ;;  %s277_s0 = inlined_call_operand.vmem [shape: f32[8,256], index: 0, kind: input, shape index: {}]   ;;  %s278_s2 = inlined_call_operand.vmem [shape: f32[8,64], index: 2, kind: output, shape index: {}]  }
   0x1   :  { %v44_v0 = vld [vmem:[%s276_s1 + $0xf8] sm:$0xff]  ;;  %v43_v2 = vld [vmem:[%s276_s1 + $0xf0] sm:$0xff]  ;;  %v42_v4 = vld [vmem:[%s276_s1 + $0xe8] sm:$0xff] }
   0x2   :  { %v28_v1 = vld [vmem:[%s276_s1 + $0x78] sm:$0xff]  ;;  %121 = vmatprep.subr.mxu0 %v44_v0  ;;  %v27_v3 = vld [vmem:[%s276_s1 + $0x70] sm:$0xff]  ;;  %v26_v5 = vld [vmem:[%s276_s1 + $0x68] sm:$0xff] }
   0x3   :  { %122 = vmatpush3.msra.mxu0 %v28_v1  ;;  %v41_v6 = vld [vmem:[%s276_s1 + $0xe0] sm:$0xff]  ;;  %v40_v8 = vld [vmem:[%s276_s1 + $0xd8] sm:$0xff]  ;;  %v39_v10 = vld [vmem:[%s276_s1 + $0xd0] sm:$0xff] }
   0x4   :  { %123 = vmatprep.subr.mxu0 %v43_v2  ;;  %v25_v7 = vld [vmem:[%s276_s1 + $0x60] sm:$0xff]  ;;  %v24_v9 = vld [vmem:[%s276_s1 + $0x58] sm:$0xff]  ;;  %v23_v11 = vld [vmem:[%s276_s1 + $0x50] sm:$0xff] }
   0x5   :  { %124 = vmatpush3.msra.mxu0 %v27_v3  ;;  %v38_v12 = vld [vmem:[%s276_s1 + $0xc8] sm:$0xff]  ;;  %v37_v15 = vld [vmem:[%s276_s1 + $0xc0] sm:$0xff]  ;;  %v36_v17 = vld [vmem:[%s276_s1 + $0xb8] sm:$0xff] }
   0x6   :  { %125 = vmatprep.subr.mxu0 %v42_v4  ;;  %v12_v13 = vld [vmem:[%s277_s0 + $0x8] sm:$0xff]  ;;  %v21_v16 = vld [vmem:[%s276_s1 + $0x40] sm:$0xff]  ;;  %v20_v18 = vld [vmem:[%s276_s1 + $0x38] sm:$0xff] }
   0x7   :  { %126 = vmatpush3.msra.mxu0 %v26_v5  ;;  %v22_v14 = vld [vmem:[%s276_s1 + $0x48] sm:$0xff]  ;;  %109 = vmatprep.mubr.f32.mxu0 %v12_v13  ;;  %v35_v19 = vld [vmem:[%s276_s1 + $0xb0] sm:$0xff]  ;;  %v33_v23 = vld [vmem:[%s276_s1 + $0xa0] sm:$0xff] }
   0x8   :  { %127 = vmatprep.subr.mxu0 %v41_v6  ;;  %v19_v20 = vld [vmem:[%s276_s1 + $0x30] sm:$0xff]  ;;  %v34_v21 = vld [vmem:[%s276_s1 + $0xa8] sm:$0xff]  ;;  %v17_v24 = vld [vmem:[%s276_s1 + $0x20] sm:$0xff] }
   0x9   :  { %128 = vmatpush3.msra.mxu0 %v25_v7  ;;  %v18_v22 = vld [vmem:[%s276_s1 + $0x28] sm:$0xff]  ;;  %v32_v25 = vld [vmem:[%s276_s1 + $0x98] sm:$0xff]  ;;  %v31_v27 = vld [vmem:[%s276_s1 + $0x90] sm:$0xff] }
   0xa   :  { %129 = vmatprep.subr.mxu0 %v40_v8  ;;  %v16_v26 = vld [vmem:[%s276_s1 + $0x18] sm:$0xff]  ;;  %v15_v28 = vld [vmem:[%s276_s1 + $0x10] sm:$0xff]  ;;  %v30_v29 = vld [vmem:[%s276_s1 + $0x88] sm:$0xff] }
   0xb   :  { %130 = vmatpush3.msra.mxu0 %v24_v9  ;;  %v14_v30 = vld [vmem:[%s276_s1 + $0x8] sm:$0xff]  ;;  %v29_v31 = vld [vmem:[%s276_s1 + $0x80] sm:$0xff] }
   0xc   :  { %131 = vmatprep.subr.mxu0 %v39_v10  ;;  %v13_v32 = vld [vmem:[%s276_s1] sm:$0xff] }
   0xd   :  { %132 = vmatpush3.msra.mxu0 %v23_v11  ;;  %v11_v33 = vld [vmem:[%s277_s0] sm:$0xff] }
   0xe   :  { %133 = vmatprep.subr.mxu0 %v38_v12 }
   0xf   :  { %134 = vmatpush3.msra.mxu0 %v22_v14 }
  0x10   :  { %135 = vmatprep.subr.mxu0 %v37_v15 }
  0x11   :  { %136 = vmatpush3.msra.mxu0 %v21_v16 }
  0x12   :  { %137 = vmatprep.subr.mxu0 %v36_v17 }
  0x13   :  { %138 = vmatpush3.msra.mxu0 %v20_v18 }
  0x14   :  { %139 = vmatprep.subr.mxu0 %v35_v19 }
  0x15   :  { %140 = vmatpush3.msra.mxu0 %v19_v20 }
  0x16   :  { %141 = vmatprep.subr.mxu0 %v34_v21 }
  0x17   :  { %142 = vmatpush3.msra.mxu0 %v18_v22 }
  0x18   :  { %143 = vmatprep.subr.mxu0 %v33_v23 }
  0x19   :  { %144 = vmatpush3.msra.mxu0 %v17_v24 }
  0x1a   :  { %145 = vmatprep.subr.mxu0 %v32_v25 }
  0x1b   :  { %146 = vmatpush3.msra.mxu0 %v16_v26 }
  0x1c   :  { %147 = vmatprep.subr.mxu0 %v31_v27 }
  0x1d   :  { %148 = vmatpush3.msra.mxu0 %v15_v28 }
  0x1e   :  { %149 = vmatprep.subr.mxu0 %v30_v29 }
  0x1f   :  { %150 = vmatpush3.msra.mxu0 %v14_v30 }
  0x20   :  { %151 = vmatprep.subr.mxu0 %v29_v31 }
  0x21   :  { %152 = vmatpush3.msra.mxu0 %v13_v32 }
  0x22   :  { %110 = vmatmul.mubr.f32.vlgmr.msra.gmra.mxu0 %v11_v33 }
  0xe2   :  { %v153_v34 = vpop.f32.mrf.mxu0 }
  0xe4   :  { %v154_v35 = vpop.f32.mrf.mxu0 }
  0xe5   :  { %v155_v36 = vadd.f32 %v154_v35, %v153_v34 }
  0xe7   :  { %116 = vst.msk [vmem:[%s278_s2] sm:$0xff] %vm115_vm0, %v155_v36 }

</bundles_post_ra>
